<compile_context>
chip_gen: v6e
topology: v6e:2x2x1
jax: 0.10.0
libtpu: 0.0.40
codegen_flags: <defaults>
</compile_context>

<pallas_src>
import jax
import jax.numpy as jnp
from jax.experimental import pallas as pl
from jax.experimental.pallas import tpu as pltpu  # noqa: F401  (TPU backend)


def _round_up(v, m):
    return ((v + m - 1) // m) * m


def _patch_embed_kernel(p_ref, w_ref, b_ref, o_ref):
    # p_ref: (M, K)      f32 flattened patches
    # w_ref: (K, E_pad)  f32 flattened conv weight (transposed), lane-dense
    # b_ref: (1, E_pad)  f32 bias (zero-padded)
    # o_ref: (M, E_pad)  output tile
    acc = jnp.dot(p_ref[...], w_ref[...], preferred_element_type=jnp.float32)
    o_ref[...] = (acc + b_ref[...]).astype(o_ref.dtype)


def patch_embedding(x, weight, bias, patch_size):
    """x: [B, C, H, W] (NCHW), weight: [E, C, P, P] (OIHW), bias: [E].

    Returns [B, num_patches, E], matching PatchEmbedding.forward.
    """
    B, C, H, W = x.shape
    E = weight.shape[0]
    P = patch_size
    assert H % P == 0 and W % P == 0
    Gh, Gw = H // P, W // P
    N = Gh * Gw
    K = C * P * P
    M = B * N

    # ---- im2col glue (one fused XLA copy at these shapes; see TODO) --------
    patches = x.reshape(B, C, Gh, P, Gw, P)
    patches = patches.transpose(0, 2, 4, 1, 3, 5).reshape(M, K)

    # ---- one-time parameter prep: [K, E_pad] weight + bias row -------------
    E_pad = _round_up(E, 128)  # lane-dense output -> unmasked stores
    w_flat = weight.reshape(E, K).T                            # [K, E]
    w_pad = jnp.zeros((K, E_pad), w_flat.dtype).at[:, :E].set(w_flat)
    b_row = jnp.zeros((1, E_pad), jnp.float32).at[0, :E].set(
        bias.astype(jnp.float32))

    cost = pl.CostEstimate(
        flops=2 * M * K * E_pad,
        transcendentals=0,
        bytes_accessed=(patches.size * 4 + w_pad.size * 4
                        + b_row.size * 4 + M * E_pad * 4),
    )

    out_pad = pl.pallas_call(
        _patch_embed_kernel,
        out_shape=jax.ShapeDtypeStruct((M, E_pad), x.dtype),
        grid_spec=pl.GridSpec(
            grid=(1,),
            in_specs=[
                pl.BlockSpec((M, K), lambda i: (0, 0)),       # full extent
                pl.BlockSpec((K, E_pad), lambda i: (0, 0)),   # full extent
                pl.BlockSpec((1, E_pad), lambda i: (0, 0)),   # full extent
            ],
            out_specs=pl.BlockSpec((M, E_pad), lambda i: (0, 0)),
        ),
        cost_estimate=cost,
    )(patches, w_pad, b_row)

    # Strip E padding, restore [B, N, E].
    return out_pad[:, :E].reshape(B, N, E)


def _reference(x, weight, bias, patch_size):
    # Pure-JAX reference using a real convolution (NCHW / OIHW).
    y = jax.lax.conv_general_dilated(
        x, weight,
        window_strides=(patch_size, patch_size),
        padding="VALID",
        dimension_numbers=("NCHW", "OIHW", "NCHW"),
    ) + bias.reshape(1, -1, 1, 1)
    B, E = y.shape[0], y.shape[1]
    y = y.reshape(B, E, -1)             # flatten(start_dim=2)
    return jnp.transpose(y, (0, 2, 1))  # permute(0, 2, 1)


if __name__ == "__main__":
    # Module defaults: in_channels=1, image_size=28, patch_size=4, embed_dim=64
    B, C, HW, P, E = 2, 1, 28, 4, 64

    key = jax.random.PRNGKey(0)
    kx, kw, kb = jax.random.split(key, 3)

    x = jax.random.normal(kx, (B, C, HW, HW), dtype=jnp.float32)
    # Deterministic synthetic parameters (Conv2d weight [E, C, P, P], bias [E]).
    fan_in = C * P * P
    bound = 1.0 / jnp.sqrt(fan_in)
    weight = jax.random.uniform(kw, (E, C, P, P), jnp.float32, -bound, bound)
    bias = jax.random.uniform(kb, (E,), jnp.float32, -bound, bound)

    out = patch_embedding(x, weight, bias, P)
    out = jax.block_until_ready(out)

    ref = _reference(x, weight, bias, P)
    assert out.shape == (B, (HW // P) ** 2, E), out.shape
    # Tolerance covers MXU f32 matmul pass behaviour across TPU generations.
    assert jnp.allclose(out, ref, atol=1e-2, rtol=1e-2), "mismatch vs reference"

    print("KERNEL_OK")
</pallas_src>

<mosaic_0001>
module attributes {stable_mosaic.version = 11 : i64} {
  func.func @_patch_embed_kernel(%arg0: i32, %arg1: memref<98x16xf32, #tpu.memory_space<vmem>>, %arg2: memref<16x128xf32, #tpu.memory_space<vmem>>, %arg3: memref<1x128xf32, #tpu.memory_space<vmem>>, %arg4: memref<98x128xf32, #tpu.memory_space<vmem>>) attributes {dimension_semantics = [#tpu.dimension_semantics<arbitrary>], iteration_bounds = array<i64: 1>, scalar_prefetch = 0 : i64, scratch_operands = 0 : i64, tpu.core_type = #tpu.core_type<tc>, window_params = [{pipeline_mode = #tpu.pipeline_mode<synchronous>, transform_indices = @transform_0, window_bounds = array<i64: 98, 16>}, {pipeline_mode = #tpu.pipeline_mode<synchronous>, transform_indices = @transform_1, window_bounds = array<i64: 16, 128>}, {pipeline_mode = #tpu.pipeline_mode<synchronous>, transform_indices = @transform_2, window_bounds = array<i64: 1, 128>}, {pipeline_mode = #tpu.pipeline_mode<synchronous>, transform_indices = @transform_3, window_bounds = array<i64: 98, 128>}]} {
    %c0 = arith.constant 0 : index
    %c0_0 = arith.constant 0 : index
    %0 = vector.load %arg1[%c0, %c0_0] : memref<98x16xf32, #tpu.memory_space<vmem>>, vector<98x16xf32>
    %c0_1 = arith.constant 0 : index
    %c0_2 = arith.constant 0 : index
    %1 = vector.load %arg2[%c0_1, %c0_2] : memref<16x128xf32, #tpu.memory_space<vmem>>, vector<16x128xf32>
    %cst = arith.constant dense<0.000000e+00> : vector<98x128xf32>
    %2 = tpu.matmul %0, %1, %cst {dimension_numbers = #tpu.dot_dimension_numbers<[1], [0], [0], [1], [0, 0, 1, 1], [], []>} : vector<98x16xf32>, vector<16x128xf32>, vector<98x128xf32> -> vector<98x128xf32>
    %c0_3 = arith.constant 0 : index
    %c0_4 = arith.constant 0 : index
    %3 = vector.load %arg3[%c0_3, %c0_4] : memref<1x128xf32, #tpu.memory_space<vmem>>, vector<1x128xf32>
    %4 = vector.broadcast %3 : vector<1x128xf32> to vector<98x128xf32>
    %5 = arith.addf %2, %4 : vector<98x128xf32>
    %c0_5 = arith.constant 0 : index
    %c0_6 = arith.constant 0 : index
    %6 = vector.load %arg4[%c0_5, %c0_6] : memref<98x128xf32, #tpu.memory_space<vmem>>, vector<98x128xf32>
    tpu.vector_store %arg4[%c0_5, %c0_6], %5 {strides = array<i32>} : memref<98x128xf32, #tpu.memory_space<vmem>>, vector<98x128xf32>,
    return
  }
  func.func @transform_0(%arg0: i32) -> (i32, i32) {
    %c0_i32 = arith.constant 0 : i32
    %c0_i32_0 = arith.constant 0 : i32
    %c0_i32_1 = arith.constant 0 : i32
    return %c0_i32, %c0_i32_0 : i32, i32
  }
  func.func @transform_1(%arg0: i32) -> (i32, i32) {
    %c0_i32 = arith.constant 0 : i32
    %c0_i32_0 = arith.constant 0 : i32
    %c0_i32_1 = arith.constant 0 : i32
    return %c0_i32, %c0_i32_0 : i32, i32
  }
  func.func @transform_2(%arg0: i32) -> (i32, i32) {
    %c0_i32 = arith.constant 0 : i32
    %c0_i32_0 = arith.constant 0 : i32
    %c0_i32_1 = arith.constant 0 : i32
    return %c0_i32, %c0_i32_0 : i32, i32
  }
  func.func @transform_3(%arg0: i32) -> (i32, i32) {
    %c0_i32 = arith.constant 0 : i32
    %c0_i32_0 = arith.constant 0 : i32
    %c0_i32_1 = arith.constant 0 : i32
    return %c0_i32, %c0_i32_0 : i32, i32
  }
}

</mosaic_0001>

<bundles_post_ra>
// kernel: tpu_custom_call.1
= control target key start
LH: loop header
LB: loop body
LE: loop exit
PB: predicated region body
PF: predicated region fallthrough
CT: control target
= control target key end

     0   :  { %v339_v1 = vmov 0.0   ;;  %vm37_vm0 = vcmask 130048   ;;  %vm340_vm1 = vmmov 0   ;;  %s441_s0 = inlined_call_operand.vmem [shape: f32[98,16], index: 0, kind: input, shape index: {}]   ;;  %s442_s1 = inlined_call_operand.vmem [shape: f32[16,128], index: 1, kind: input, shape index: {}]   ;;  %s443_s2 = inlined_call_operand.vmem [shape: f32[1,128], index: 2, kind: input, shape index: {}]   ;;  %s444_s3 = inlined_call_operand.hbm [shape: f32[98,128], index: 3, kind: output, shape index: {}]  }
   0x1   :  { %v29_v0 = vld [vmem:[%s442_s1 + $0x8] sm:$0xff]  ;;  %265 = vmatprep.subr.mxu0 %v339_v1  ;;  %308 = vmatprep.subr.mxu1 %v339_v1  ;;  %v28_v2 = vld [vmem:[%s442_s1] sm:$0xff]  ;;  %v22_v4 = vld [vmem:[%s441_s0 + $0x38] sm:$0xff] }
   0x2   :  { %266 = vmatpush3.msra.mxu0 %v29_v0  ;;  %310 = vmatpush3.msra.mxu1 %v29_v0  ;;  %v15_v3 = vld [vmem:[%s441_s0] sm:$0xff] }
   0x3   :  { %267 = vmatprep.subr.mxu0 %v339_v1  ;;  %269 = vmatprep.mubr.msk.f32.mxu0 %vm340_vm1, %v339_v1 }
   0x4   :  { %268 = vmatpush3.msra.mxu0 %v28_v2  ;;  %309 = vmatprep.subr.mxu1 %v339_v1 }
   0x5   :  { %270 = vmatmul.mubr.msk.f32.vlgmr.msra.gmra.mxu0 %vm37_vm0, %v15_v3  ;;  %311 = vmatpush3.msra.mxu1 %v28_v2 }
   0x6   :  { %8 = vsyncpa [#allocation3], 0  ;;  %290 = vmatprep.mubr.msk.f32.mxu1 %vm340_vm1, %v339_v1  ;;  %272 = vmatprep.mubr.msk.f32.mxu0 %vm340_vm1, %v339_v1  ;;  %v16_v5 = vld [vmem:[%s441_s0 + $0x8] sm:$0xff]  ;;  %v23_v6 = vld [vmem:[%s441_s0 + $0x40] sm:$0xff] }
   0x7   :  { %291 = vmatmul.mubr.msk.f32.vlgmr.msra.gmra.mxu1 %vm37_vm0, %v22_v4  ;;  %v17_v7 = vld [vmem:[%s441_s0 + $0x10] sm:$0xff]  ;;  %v24_v8 = vld [vmem:[%s441_s0 + $0x48] sm:$0xff]  ;;  %v18_v9 = vld [vmem:[%s441_s0 + $0x18] sm:$0xff] }
   0x8   :  { %293 = vmatprep.mubr.msk.f32.mxu1 %vm340_vm1, %v339_v1  ;;  %v25_v10 = vld [vmem:[%s441_s0 + $0x50] sm:$0xff]  ;;  %v19_v11 = vld [vmem:[%s441_s0 + $0x20] sm:$0xff]  ;;  %v26_v12 = vld [vmem:[%s441_s0 + $0x58] sm:$0xff] }
   0x9   :  { %273 = vmatmul.mubr.msk.f32.gmra.mxu0 %vm37_vm0, %v16_v5  ;;  %v20_v13 = vld [vmem:[%s441_s0 + $0x28] sm:$0xff]  ;;  %v27_v14 = vld [vmem:[%s441_s0 + $0x60] sm:$0x3]  ;;  %v21_v15 = vld [vmem:[%s441_s0 + $0x30] sm:$0xff]  ;;  %s341_s0 = smov [#allocation2]  }
   0xa   :  { %275 = vmatprep.mubr.msk.f32.mxu0 %vm340_vm1, %v339_v1  ;;  %v236_v16 = vld [vmem:[%s443_s2] ss:$0 sm:$0xff]  ;;  %s225_s2 = sshll.u32 %s341_s0, 4  ;;  %s226_s2 = int_to_ptr.vmem [resolvable:$true] %s225_s2 }
   0xb   :  { %294 = vmatmul.mubr.msk.f32.gmra.mxu1 %vm37_vm0, %v23_v6  ;;  %s317_s16 = scalar_lea.vmem %s226_s2, 1664  ;;  %p322_p1 = scmp.lt.s32.totalorder %s226_s2, %s226_s2 }
   0xc   :  { %296 = vmatprep.mubr.msk.f32.mxu1 %vm340_vm1, %v339_v1  ;;  %p318_p0 = scmp.ne.s32.totalorder %s226_s2, %s317_s16  ;;  %p323_p2 = scmp.lt.s32.totalorder %s317_s16, %s317_s16 }
   0xd   :  { %276 = vmatmul.mubr.msk.f32.gmra.mxu0 %vm37_vm0, %v17_v7 }
   0xe   :  { %278 = vmatprep.mubr.msk.f32.mxu0 %vm340_vm1, %v339_v1  ;;  %p324_p3 = por %p323_p2, %p322_p1 }
   0xf   :  { %297 = vmatmul.mubr.msk.f32.gmra.mxu1 %vm37_vm0, %v24_v8 }
  0x10   :  { %299 = vmatprep.mubr.msk.f32.mxu1 %vm340_vm1, %v339_v1  ;;  %p325_p4 = pnand %p324_p3, %p318_p0 }
  0x11   :  { %279 = vmatmul.mubr.msk.f32.gmra.mxu0 %vm37_vm0, %v18_v9 }
  0x12   :  { %281 = vmatprep.mubr.msk.f32.mxu0 %vm340_vm1, %v339_v1 }
  0x13   :  { %300 = vmatmul.mubr.msk.f32.gmra.mxu1 %vm37_vm0, %v25_v10 }
  0x14   :  { %302 = vmatprep.mubr.msk.f32.mxu1 %vm340_vm1, %v339_v1 }
  0x15   :  { %282 = vmatmul.mubr.msk.f32.gmra.mxu0 %vm37_vm0, %v19_v11 }
  0x16   :  { %284 = vmatprep.mubr.msk.f32.mxu0 %vm340_vm1, %v339_v1 }
  0x17   :  { %303 = vmatmul.mubr.msk.f32.gmra.mxu1 %vm37_vm0, %v26_v12 }
  0x18   :  { %305 = vmatprep.mubr.msk.f32.mxu1 %vm340_vm1, %v339_v1 }
  0x19   :  { %285 = vmatmul.mubr.msk.f32.gmra.mxu0 %vm37_vm0, %v20_v13 }
  0x1a   :  { %287 = vmatprep.mubr.msk.f32.mxu0 %vm340_vm1, %v339_v1 }
  0x1b   :  { %306 = vmatmul.mubr.msk.f32.gmra.mxu1 %vm37_vm0, %v27_v14 }
  0x1d   :  { %288 = vmatmul.mubr.msk.f32.gmra.mxu0 %vm37_vm0, %v21_v15 }
  0xc5   :  { %v143_v17 = vpop.f32.mrf.mxu0 }
  0xc6   :  { %v144_v18 = vadd.f32 %v236_v16, %v143_v17 }
  0xc7   :  { %v271_v19 = vpop.f32.mrf.mxu0  ;;  %v178_v20 = vpop.f32.mrf.mxu1 }
  0xc8   :  { %207 = vst [vmem:[#allocation2] sm:$0xff] %v144_v18  ;;  %v179_v21 = vadd.f32 %v236_v16, %v178_v20 }
  0xc9   :  { %v148_v22 = vpop.f32.mrf.mxu0  ;;  %v292_v23 = vpop.f32.mrf.mxu1 }
  0xca   :  { %214 = vst [vmem:[#allocation2 + $0x38] sm:$0xff] %v179_v21  ;;  %v149_v24 = vadd.f32 %v236_v16, %v148_v22 }
  0xcb   :  { %v274_v25 = vpop.f32.mrf.mxu0  ;;  %v183_v26 = vpop.f32.mrf.mxu1 }
  0xcc   :  { %208 = vst [vmem:[#allocation2 + $0x8] sm:$0xff] %v149_v24  ;;  %v184_v27 = vadd.f32 %v236_v16, %v183_v26 }
  0xcd   :  { %v153_v28 = vpop.f32.mrf.mxu0  ;;  %v295_v29 = vpop.f32.mrf.mxu1 }
  0xce   :  { %215 = vst [vmem:[#allocation2 + $0x40] sm:$0xff] %v184_v27  ;;  %v154_v30 = vadd.f32 %v236_v16, %v153_v28 }
  0xcf   :  { %v277_v31 = vpop.f32.mrf.mxu0  ;;  %v188_v32 = vpop.f32.mrf.mxu1 }
  0xd0   :  { %209 = vst [vmem:[#allocation2 + $0x10] sm:$0xff] %v154_v30  ;;  %v189_v33 = vadd.f32 %v236_v16, %v188_v32 }
  0xd1   :  { %v158_v34 = vpop.f32.mrf.mxu0  ;;  %v298_v35 = vpop.f32.mrf.mxu1 }
  0xd2   :  { %216 = vst [vmem:[#allocation2 + $0x48] sm:$0xff] %v189_v33  ;;  %v159_v36 = vadd.f32 %v236_v16, %v158_v34 }
  0xd3   :  { %v280_v37 = vpop.f32.mrf.mxu0  ;;  %v193_v38 = vpop.f32.mrf.mxu1 }
  0xd4   :  { %210 = vst [vmem:[#allocation2 + $0x18] sm:$0xff] %v159_v36  ;;  %v194_v39 = vadd.f32 %v236_v16, %v193_v38 }
  0xd5   :  { %v163_v40 = vpop.f32.mrf.mxu0  ;;  %v301_v41 = vpop.f32.mrf.mxu1 }
  0xd6   :  { %217 = vst [vmem:[#allocation2 + $0x50] sm:$0xff] %v194_v39  ;;  %v164_v42 = vadd.f32 %v236_v16, %v163_v40 }
  0xd7   :  { %v283_v43 = vpop.f32.mrf.mxu0  ;;  %v198_v44 = vpop.f32.mrf.mxu1 }
  0xd8   :  { %211 = vst [vmem:[#allocation2 + $0x20] sm:$0xff] %v164_v42  ;;  %v199_v45 = vadd.f32 %v236_v16, %v198_v44 }
  0xd9   :  { %v168_v46 = vpop.f32.mrf.mxu0  ;;  %v304_v47 = vpop.f32.mrf.mxu1 }
  0xda   :  { %218 = vst [vmem:[#allocation2 + $0x58] sm:$0xff] %v199_v45  ;;  %v169_v48 = vadd.f32 %v236_v16, %v168_v46 }
  0xdb   :  { %v286_v49 = vpop.f32.mrf.mxu0  ;;  %v203_v50 = vpop.f32.mrf.mxu1 }
  0xdc   :  { %212 = vst [vmem:[#allocation2 + $0x28] sm:$0xff] %v169_v48  ;;  %v204_v51 = vadd.f32 %v236_v16, %v203_v50 }
  0xdd   :  { %v173_v52 = vpop.f32.mrf.mxu0  ;;  %v307_v53 = vpop.f32.mrf.mxu1 }
  0xde   :  { %219 = vst [vmem:[#allocation2 + $0x60] sm:$0x3] %v204_v51  ;;  %v174_v54 = vadd.f32 %v236_v16, %v173_v52 }
  0xdf   :  { %v289_v55 = vpop.f32.mrf.mxu0 }
  0xe0   :  { %213 = vst [vmem:[#allocation2 + $0x30] sm:$0xff] %v174_v54 }
  0xe1   :  { %328 = shalt.err (!%p325_p4)
}
  0xe2   :  { %s342_s17 = smov 128   ;;  %s343_s18 = smov 8  }
  0xe3   :  { %231 = dma.vmem_to_hbm [thread:$0]  %s226_s2, 1664, %s444_s3, [#allocation3], %s342_s17, %s342_s17, %s343_s18  }
  0xe4   :  { %337 = dma.done.wait [#allocation3], 1664  }
  0xe5   :  { %338 = vsyncadd [#allocation3], 4294965632 }
  0xe6   :  { %235 = vsyncpa [#allocation3], 1 }

</bundles_post_ra>
